<compile_context>
chip_gen: v7x
topology: tpu7x:2x2x1
jax: 0.10.0
libtpu: 0.0.40
codegen_flags: <defaults>
</compile_context>

<pallas_src>
import functools
import math

import jax
import jax.numpy as jnp
from jax import lax
from jax.experimental import pallas as pl
from jax.experimental.pallas import tpu as pltpu


COS_T = 0.1          # CosKernel temperature
COS_EPS = 1e-6       # CosKernel eps (folded away by pre-normalization; O(1e-8) rel diff)
CLS_SCALE = 10.0     # (distances - max) * 10


def _decoder_kernel(f1_ref, f2_ref, cls_ref, cert_ref, flow_ref, *, res):
    # f1_ref : (1, tn, d)  query features (one n-tile of one batch element)
    # f2_ref : (1, d, m)   support features, d-major (resident across n-tiles)
    # cls_ref : (1, tn, m) gm_warp_or_cls (pixels-major layout; == gm_cls)
    # cert_ref: (1, tn, 1) gm_certainty
    # flow_ref: (1, tn, 2) flow (x, y)
    f1 = f1_ref[0]                                                # (tn, d)
    f2 = f2_ref[0]                                                # (d, m)
    m = f2.shape[1]

    # Pre-normalize instead of dividing the (tn, m) product by ||f1||*||f2||.
    inv1 = lax.rsqrt(jnp.sum(f1 * f1, axis=-1, keepdims=True))    # (tn, 1)
    inv2 = lax.rsqrt(jnp.sum(f2 * f2, axis=0, keepdims=True))     # (1, m)
    f1n = f1 * inv1
    f2n = f2 * inv2

    # Cosine similarity on the MXU in native (M,K)x(K,N) layout (no transpose).
    c = jnp.dot(f1n, f2n, preferred_element_type=jnp.float32)     # (tn, m)
    k = jnp.exp((c - 1.0) * (1.0 / COS_T))                        # (tn, m)  EUP

    # Single cross-lane row-max; reused for both gm and the argmax mask.
    max_vals = jnp.max(k, axis=-1, keepdims=True)                 # (tn, 1)
    gm = (k - max_vals) * CLS_SCALE                               # (tn, m)
    cls_ref[0] = gm

    # gm_certainty = max_m((k - max_m k) * 10) == 0 identically (bit-exact).
    cert_ref[...] = jnp.zeros_like(cert_ref)

    # cls_to_flow: first maximal index (torch argmax semantics) -> arithmetic
    # decode of the coordinate grid G[i*res+j] = (lin[j], lin[i]),
    # lin[t] = (2t + 1)/res - 1.
    col = lax.broadcasted_iota(jnp.int32, k.shape, 1)             # (tn, m)
    idx = jnp.min(jnp.where(k == max_vals, col, m),
                  axis=-1, keepdims=True)                         # (tn, 1)
    if res & (res - 1) == 0:
        # Power-of-two grid (the usual case): exact bit decode on the VPU.
        shift = int(math.log2(res))
        ii = jnp.right_shift(idx, shift).astype(jnp.float32)      # idx // res
        jj = jnp.bitwise_and(idx, res - 1).astype(jnp.float32)    # idx %  res
    else:
        # Float decode; exact for res up to ~1024 given the +0.5 guard.
        idx_f = idx.astype(jnp.float32)
        ii = jnp.floor((idx_f + 0.5) * (1.0 / res))
        jj = idx_f - ii * float(res)
    fx = (2.0 * jj + 1.0) * (1.0 / res) - 1.0
    fy = (2.0 * ii + 1.0) * (1.0 / res) - 1.0
    flow_ref[0] = jnp.concatenate([fx, fy], axis=-1)              # (tn, 2)


def _choose_tile_n(n: int, m: int, d: int, budget_bytes: int = 12 << 20) -> int:
    """Largest multiple-of-8 divisor of n (<= 512) whose VMEM estimate fits."""
    candidates = [t for t in range(8, n + 1, 8) if n % t == 0]
    if not candidates:
        return n          # n not a multiple of 8 (tiny inputs): one full tile
    tile = candidates[0]
    for t in candidates:
        if t > 512:
            break
        # double-buffered f1 + gm_cls blocks, resident f2, ~3 live (t, m) temps
        est = 4 * (2 * t * d + 5 * t * m + 2 * d * m)
        if est <= budget_bytes:
            tile = t
    return tile


def mnn_decoder(fs_1: jnp.ndarray, fs_2: jnp.ndarray, *, tile_n: int | None = None):
    """Pallas implementation of mnn_matcher.decoder. Inputs are NCHW (b,d,h,w)."""
    b, d, h, w = fs_1.shape
    _, _, h2, w2 = fs_2.shape
    n = h * w
    m = h2 * w2
    res = int(round(math.sqrt(m)))

    f1 = jnp.transpose(fs_1, (0, 2, 3, 1)).reshape(b, n, d).astype(jnp.float32)
    f2 = fs_2.reshape(b, d, m).astype(jnp.float32)   # NCHW is already d-major

    tn = tile_n if tile_n is not None else _choose_tile_n(n, m, d)
    assert n % tn == 0, "tile_n must divide h*w"
    n_tiles = n // tn

    out_shapes = (
        jax.ShapeDtypeStruct((b, n, m), jnp.float32),  # gm_cls (pixels-major)
        jax.ShapeDtypeStruct((b, n, 1), jnp.float32),  # gm_certainty
        jax.ShapeDtypeStruct((b, n, 2), jnp.float32),  # flow
    )
    grid_spec = pltpu.PrefetchScalarGridSpec(
        num_scalar_prefetch=0,
        grid=(b, n_tiles),
        in_specs=[
            pl.BlockSpec((1, tn, d), lambda bi, ni: (bi, ni, 0)),
            pl.BlockSpec((1, d, m), lambda bi, ni: (bi, 0, 0)),   # resident over ni
        ],
        out_specs=(
            pl.BlockSpec((1, tn, m), lambda bi, ni: (bi, ni, 0)),
            pl.BlockSpec((1, tn, 1), lambda bi, ni: (bi, ni, 0)),
            pl.BlockSpec((1, tn, 2), lambda bi, ni: (bi, ni, 0)),
        ),
    )
    gm_cls, cert, flow = pl.pallas_call(
        functools.partial(_decoder_kernel, res=res),
        out_shape=out_shapes,
        grid_spec=grid_spec,
        compiler_params=pltpu.CompilerParams(
            dimension_semantics=("parallel", "parallel"),
            vmem_limit_bytes=32 * 1024 * 1024,
        ),
    )(f1, f2)

    # glue: back to PyTorch NCHW conventions
    gm_cls = gm_cls.reshape(b, h, w, m).transpose(0, 3, 1, 2)   # (b, m, h, w)
    cert = cert.reshape(b, h, w, 1).transpose(0, 3, 1, 2)       # (b, 1, h, w)
    flow = flow.reshape(b, h, w, 2).transpose(0, 3, 1, 2)       # (b, 2, h, w)
    return {"gm_cls": gm_cls, "gm_certainty": cert, "flow": flow}


def _make_grid(m: int) -> jnp.ndarray:
    """cls_to_flow coordinate grid G of shape (m, 2) (reference only)."""
    res = int(round(math.sqrt(m)))
    lin = jnp.linspace(-1.0 + 1.0 / res, 1.0 - 1.0 / res, res, dtype=jnp.float32)
    gi, gj = jnp.meshgrid(lin, lin, indexing="ij")
    return jnp.stack([gj, gi], axis=-1).reshape(m, 2)


def mnn_decoder_ref(fs_1, fs_2):
    """Pure-JAX reference mirroring the PyTorch decoder semantics."""
    b, d, h, w = fs_1.shape
    _, _, h2, w2 = fs_2.shape
    n, m = h * w, h2 * w2
    f1 = jnp.transpose(fs_1, (0, 2, 3, 1)).reshape(b, n, d)
    f2 = jnp.transpose(fs_2, (0, 2, 3, 1)).reshape(b, m, d)
    c = jnp.einsum("bnd,bmd->bnm", f1, f2) / (
        jnp.linalg.norm(f1, axis=-1)[..., None]
        * jnp.linalg.norm(f2, axis=-1)[:, None, :]
        + COS_EPS
    )
    k = jnp.exp((c - 1.0) / COS_T)
    max_vals = jnp.max(k, axis=-1, keepdims=True)
    gm = (k - max_vals) * CLS_SCALE                              # (b, n, m)
    cert = jnp.max(gm, axis=-1, keepdims=True)
    G = _make_grid(m)
    idx = jnp.argmax(gm, axis=-1)                                # (b, n)
    flow = G[idx]                                                # (b, n, 2)
    return {
        "gm_cls": gm.reshape(b, h, w, m).transpose(0, 3, 1, 2),
        "gm_certainty": cert.reshape(b, h, w, 1).transpose(0, 3, 1, 2),
        "flow": flow.reshape(b, h, w, 2).transpose(0, 3, 1, 2),
    }


if __name__ == "__main__":
    key = jax.random.PRNGKey(0)
    k1, k2 = jax.random.split(key)
    b, d, h, w = 2, 32, 8, 8          # small synthetic encoder feature maps (NCHW)
    fs_1 = jax.random.normal(k1, (b, d, h, w), dtype=jnp.float32)
    fs_2 = jax.random.normal(k2, (b, d, h, w), dtype=jnp.float32)

    out = mnn_decoder(fs_1, fs_2)
    jax.block_until_ready(out)

    ref = mnn_decoder_ref(fs_1, fs_2)
    assert jnp.allclose(out["gm_cls"], ref["gm_cls"], atol=1e-4), "gm_cls mismatch"
    assert jnp.allclose(out["gm_certainty"], ref["gm_certainty"], atol=1e-4), "cert mismatch"
    assert jnp.allclose(out["flow"], ref["flow"], atol=1e-5), "flow mismatch"

    print("KERNEL_OK")
</pallas_src>

<mosaic_0001>
module attributes {stable_mosaic.version = 11 : i64} {
  func.func @_decoder_kernel(%arg0: i32, %arg1: i32, %arg2: memref<1x64x32xf32, #tpu.memory_space<vmem>>, %arg3: memref<1x32x64xf32, #tpu.memory_space<vmem>>, %arg4: memref<1x64x64xf32, #tpu.memory_space<vmem>>, %arg5: memref<1x64x1xf32, #tpu.memory_space<vmem>>, %arg6: memref<1x64x2xf32, #tpu.memory_space<vmem>>) attributes {dimension_semantics = [#tpu.dimension_semantics<parallel>, #tpu.dimension_semantics<parallel>], iteration_bounds = array<i64: 2, 1>, scalar_prefetch = 0 : i64, scratch_operands = 0 : i64, tpu.core_type = #tpu.core_type<tc>, window_params = [{transform_indices = @transform_0, window_bounds = array<i64: 1, 64, 32>}, {transform_indices = @transform_1, window_bounds = array<i64: 1, 32, 64>}, {transform_indices = @transform_2, window_bounds = array<i64: 1, 64, 64>}, {transform_indices = @transform_3, window_bounds = array<i64: 1, 64, 1>}, {transform_indices = @transform_4, window_bounds = array<i64: 1, 64, 2>}]} {
    %c0 = arith.constant 0 : index
    %c0_0 = arith.constant 0 : index
    %c0_1 = arith.constant 0 : index
    %0 = vector.load %arg2[%c0, %c0_0, %c0_1] : memref<1x64x32xf32, #tpu.memory_space<vmem>>, vector<1x64x32xf32>
    %1 = vector.shape_cast %0 : vector<1x64x32xf32> to vector<64x32xf32>
    %c0_2 = arith.constant 0 : index
    %c0_3 = arith.constant 0 : index
    %c0_4 = arith.constant 0 : index
    %2 = vector.load %arg3[%c0_2, %c0_3, %c0_4] : memref<1x32x64xf32, #tpu.memory_space<vmem>>, vector<1x32x64xf32>
    %3 = vector.shape_cast %2 : vector<1x32x64xf32> to vector<32x64xf32>
    %4 = arith.mulf %1, %1 : vector<64x32xf32>
    %cst = arith.constant dense<0.000000e+00> : vector<64xf32>
    %5 = vector.multi_reduction <add>, %4, %cst [1] : vector<64x32xf32> to vector<64xf32>
    %6 = vector.shape_cast %5 : vector<64xf32> to vector<64x1xf32>
    %7 = math.rsqrt %6 : vector<64x1xf32>
    %8 = arith.mulf %3, %3 : vector<32x64xf32>
    %cst_5 = arith.constant dense<0.000000e+00> : vector<64xf32>
    %9 = vector.multi_reduction <add>, %8, %cst_5 [0] : vector<32x64xf32> to vector<64xf32>
    %10 = vector.shape_cast %9 : vector<64xf32> to vector<1x64xf32>
    %11 = math.rsqrt %10 : vector<1x64xf32>
    %12 = vector.broadcast %7 : vector<64x1xf32> to vector<64x32xf32>
    %13 = arith.mulf %1, %12 : vector<64x32xf32>
    %14 = vector.broadcast %11 : vector<1x64xf32> to vector<32x64xf32>
    %15 = arith.mulf %3, %14 : vector<32x64xf32>
    %cst_6 = arith.constant dense<0.000000e+00> : vector<64x64xf32>
    %16 = tpu.matmul %13, %15, %cst_6 {dimension_numbers = #tpu.dot_dimension_numbers<[1], [0], [0], [1], [0, 0, 1, 1], [], []>} : vector<64x32xf32>, vector<32x64xf32>, vector<64x64xf32> -> vector<64x64xf32>
    %cst_7 = arith.constant 1.000000e+00 : f32
    %17 = vector.broadcast %cst_7 : f32 to vector<64x64xf32>
    %18 = arith.subf %16, %17 : vector<64x64xf32>
    %cst_8 = arith.constant 1.000000e+01 : f32
    %19 = vector.broadcast %cst_8 : f32 to vector<64x64xf32>
    %20 = arith.mulf %18, %19 : vector<64x64xf32>
    %21 = math.exp %20 : vector<64x64xf32>
    %cst_9 = arith.constant dense<0xFF800000> : vector<64xf32>
    %22 = vector.multi_reduction <maximumf>, %21, %cst_9 [1] : vector<64x64xf32> to vector<64xf32>
    %23 = vector.shape_cast %22 : vector<64xf32> to vector<64x1xf32>
    %24 = vector.broadcast %23 : vector<64x1xf32> to vector<64x64xf32>
    %25 = arith.subf %21, %24 : vector<64x64xf32>
    %cst_10 = arith.constant 1.000000e+01 : f32
    %26 = vector.broadcast %cst_10 : f32 to vector<64x64xf32>
    %27 = arith.mulf %25, %26 : vector<64x64xf32>
    %c0_11 = arith.constant 0 : index
    %c0_12 = arith.constant 0 : index
    %c0_13 = arith.constant 0 : index
    %28 = vector.load %arg4[%c0_11, %c0_12, %c0_13] : memref<1x64x64xf32, #tpu.memory_space<vmem>>, vector<1x64x64xf32>
    %29 = vector.shape_cast %28 : vector<1x64x64xf32> to vector<64x64xf32>
    %30 = vector.shape_cast %27 : vector<64x64xf32> to vector<1x64x64xf32>
    tpu.vector_store %arg4[%c0_11, %c0_12, %c0_13], %30 {strides = array<i32>} : memref<1x64x64xf32, #tpu.memory_space<vmem>>, vector<1x64x64xf32>,
    %cst_14 = arith.constant 0.000000e+00 : f32
    %31 = vector.broadcast %cst_14 : f32 to vector<1x64x1xf32>
    %c0_15 = arith.constant 0 : index
    %c0_16 = arith.constant 0 : index
    %c0_17 = arith.constant 0 : index
    %32 = vector.load %arg5[%c0_15, %c0_16, %c0_17] : memref<1x64x1xf32, #tpu.memory_space<vmem>>, vector<1x64x1xf32>
    tpu.vector_store %arg5[%c0_15, %c0_16, %c0_17], %31 {strides = array<i32>} : memref<1x64x1xf32, #tpu.memory_space<vmem>>, vector<1x64x1xf32>,
    %33 = tpu.iota {dimensions = array<i32: 1>} : vector<64x64xi32>
    %34 = vector.broadcast %23 : vector<64x1xf32> to vector<64x64xf32>
    %35 = arith.cmpf oeq, %21, %34 : vector<64x64xf32>
    %c64_i32 = arith.constant 64 : i32
    %36 = vector.broadcast %c64_i32 : i32 to vector<64x64xi32>
    %37 = arith.select %35, %33, %36 : vector<64x64xi1>, vector<64x64xi32>
    %cst_18 = arith.constant dense<2147483647> : vector<64xi32>
    %38 = vector.multi_reduction <minsi>, %37, %cst_18 [1] : vector<64x64xi32> to vector<64xi32>
    %39 = vector.shape_cast %38 : vector<64xi32> to vector<64x1xi32>
    %c3_i32 = arith.constant 3 : i32
    %40 = vector.broadcast %c3_i32 : i32 to vector<64x1xi32>
    %41 = arith.shrsi %39, %40 : vector<64x1xi32>
    %42 = arith.sitofp %41 : vector<64x1xi32> to vector<64x1xf32>
    %c7_i32 = arith.constant 7 : i32
    %43 = vector.broadcast %c7_i32 : i32 to vector<64x1xi32>
    %44 = arith.andi %39, %43 : vector<64x1xi32>
    %45 = arith.sitofp %44 : vector<64x1xi32> to vector<64x1xf32>
    %cst_19 = arith.constant 2.000000e+00 : f32
    %46 = vector.broadcast %cst_19 : f32 to vector<64x1xf32>
    %47 = arith.mulf %46, %45 : vector<64x1xf32>
    %cst_20 = arith.constant 1.000000e+00 : f32
    %48 = vector.broadcast %cst_20 : f32 to vector<64x1xf32>
    %49 = arith.addf %47, %48 : vector<64x1xf32>
    %cst_21 = arith.constant 1.250000e-01 : f32
    %50 = vector.broadcast %cst_21 : f32 to vector<64x1xf32>
    %51 = arith.mulf %49, %50 : vector<64x1xf32>
    %cst_22 = arith.constant 1.000000e+00 : f32
    %52 = vector.broadcast %cst_22 : f32 to vector<64x1xf32>
    %53 = arith.subf %51, %52 : vector<64x1xf32>
    %cst_23 = arith.constant 2.000000e+00 : f32
    %54 = vector.broadcast %cst_23 : f32 to vector<64x1xf32>
    %55 = arith.mulf %54, %42 : vector<64x1xf32>
    %cst_24 = arith.constant 1.000000e+00 : f32
    %56 = vector.broadcast %cst_24 : f32 to vector<64x1xf32>
    %57 = arith.addf %55, %56 : vector<64x1xf32>
    %cst_25 = arith.constant 1.250000e-01 : f32
    %58 = vector.broadcast %cst_25 : f32 to vector<64x1xf32>
    %59 = arith.mulf %57, %58 : vector<64x1xf32>
    %cst_26 = arith.constant 1.000000e+00 : f32
    %60 = vector.broadcast %cst_26 : f32 to vector<64x1xf32>
    %61 = arith.subf %59, %60 : vector<64x1xf32>
    %62 = tpu.concatenate %53, %61 in 1 : vector<64x1xf32>, vector<64x1xf32> -> vector<64x2xf32>
    %c0_27 = arith.constant 0 : index
    %c0_28 = arith.constant 0 : index
    %c0_29 = arith.constant 0 : index
    %63 = vector.load %arg6[%c0_27, %c0_28, %c0_29] : memref<1x64x2xf32, #tpu.memory_space<vmem>>, vector<1x64x2xf32>
    %64 = vector.shape_cast %63 : vector<1x64x2xf32> to vector<64x2xf32>
    %65 = vector.shape_cast %62 : vector<64x2xf32> to vector<1x64x2xf32>
    tpu.vector_store %arg6[%c0_27, %c0_28, %c0_29], %65 {strides = array<i32>} : memref<1x64x2xf32, #tpu.memory_space<vmem>>, vector<1x64x2xf32>,
    return
  }
  func.func @transform_0(%arg0: i32, %arg1: i32) -> (i32, i32, i32) {
    %c0_i32 = arith.constant 0 : i32
    %c0_i32_0 = arith.constant 0 : i32
    return %arg0, %arg1, %c0_i32 : i32, i32, i32
  }
  func.func @transform_1(%arg0: i32, %arg1: i32) -> (i32, i32, i32) {
    %c0_i32 = arith.constant 0 : i32
    %c0_i32_0 = arith.constant 0 : i32
    %c0_i32_1 = arith.constant 0 : i32
    return %arg0, %c0_i32, %c0_i32_0 : i32, i32, i32
  }
  func.func @transform_2(%arg0: i32, %arg1: i32) -> (i32, i32, i32) {
    %c0_i32 = arith.constant 0 : i32
    %c0_i32_0 = arith.constant 0 : i32
    return %arg0, %arg1, %c0_i32 : i32, i32, i32
  }
  func.func @transform_3(%arg0: i32, %arg1: i32) -> (i32, i32, i32) {
    %c0_i32 = arith.constant 0 : i32
    %c0_i32_0 = arith.constant 0 : i32
    return %arg0, %arg1, %c0_i32 : i32, i32, i32
  }
  func.func @transform_4(%arg0: i32, %arg1: i32) -> (i32, i32, i32) {
    %c0_i32 = arith.constant 0 : i32
    %c0_i32_0 = arith.constant 0 : i32
    return %arg0, %arg1, %c0_i32 : i32, i32, i32
  }
}

</mosaic_0001>

<bundles_post_ra>
// kernel: tpu_custom_call.1
= control target key start
LH: loop header
LB: loop body
LE: loop exit
PB: predicated region body
PF: predicated region fallthrough
CT: control target
= control target key end

     0   :  { %10 = vsyncpa [#allocation3], 0  ;;  %s1733_s0 = inlined_call_operand.vmem [shape: f32[2,64,32], index: 0, kind: input, shape index: {}]   ;;  %s1734_s1 = inlined_call_operand.vmem [shape: f32[2,32,64], index: 1, kind: input, shape index: {}]   ;;  %s1735_s2 = inlined_call_operand.hbm [shape: f32[2,64,64], index: 2, kind: output, shape index: {0}]   ;;  %s1736_s3 = inlined_call_operand.vmem [shape: f32[2,64,1], index: 3, kind: output, shape index: {1}]   ;;  %s1737_s4 = inlined_call_operand.vmem [shape: f32[2,64,2], index: 4, kind: output, shape index: {2}]  }
   0x1   :  { %12 = vsyncpa [#allocation3 + $0x1], 0  ;;  %s1355_s15 = smov 0   ;;  %s1357_s16 = smov 0  }
   0x2   :  { %s1359_s17 = smov 0   ;;  %s1361_s18 = smov 0  }
   0x3   :  { %s1363_s19 = smov 0   ;;  %s1365_s20 = smov 0  }
   0x4 LB: > { %s1054_s21 = sadd.s32 4294967295, %s1324_s20   ;;  %s1055_s22 = sadd.s32 4294967294, %s1324_s20   ;;  %s1324_s20 = sphi %s1365_s20, %s18_s20   ;;  %s1320_s19 = sphi %s1363_s19, %s1744_s19   ;;  %s1316_s18 = sphi %s1361_s18, %s1743_s18   ;;  %s1312_s17 = sphi %s1359_s17, %s1742_s17   ;;  %s1308_s16 = sphi %s1357_s16, %s1741_s16   ;;  %s1304_s15 = sphi %s1355_s15, %s1740_s15  }
   0x5   : > { %s30_s23 = sadd.s32 1, %s1320_s19  ;;  %s93_s24 = sadd.s32 1, %s1312_s17 }
   0x6   : > { %p32_p0 = scmp.ge.s32.totalorder %s30_s23, 2  ;;  %p103_p1 = scmp.ne.s32.totalorder %s1312_s17, %s1308_s16 }
   0x7   : > { %p104_p2 = scmp.eq.s32.totalorder %s1054_s21, 1  ;;  %p109_p3 = scmp.ne.s32.totalorder %s1308_s16, %s1304_s15 }
   0x8   : > { %s1746_s23 = smov (%p32_p0, %s30_s23), 0  ;;  %p110_p5 = scmp.eq.s32.totalorder %s1055_s22, 1 }
   0x9   : > { %p1395_p4 = por %p104_p2, %p103_p1  ;;  %s88_s26 = ssub.s32 %s1320_s19, %s1746_s23 }
   0xa   : > { %p1058_p6 = scmp.ge.s32.totalorder %s1324_s20, 1  ;;  %p91_p7 = scmp.eq.s32.totalorder %s88_s26, 0 }
   0xb   : > { %p1402_p8 = por %p110_p5, %p109_p3  ;;  %p205_p9 = scmp.lt.s32.totalorder %s1324_s20, 3 }
   0xc   : > { %s1408_s28 = scalar_select %p91_p7, %s1312_s17, %s93_s24  }
   0xd   : > { %p206_p10 = pnand %p1058_p6, %p205_p9 }
   0xe   : > { %p259_p11 = scmp.lt.s32.totalorder (!%p206_p10), %s1316_s18, 1  ;;  %vm587_vm0 = vcmask (!%p206_p10), 7168   ;;  %vm314_vm1 = vcmask (!%p206_p10), 261120   ;;  %v1326_v1 = vmov (!%p206_p10), 0.0   ;;  %vm351_vm2 = vcmask (!%p206_p10), 523264   ;;  %s233_s21 = sand.u32 (!%p206_p10), 1, %s1308_s16  }
   0xf   : > { %209 = sbr.rel (%p206_p10) target bundleno = 888 (0x378), region = 28  ;;  %s1059_s22 = sshll.u32 (!%p206_p10), %s233_s21, 6 }
  0x10   : > { %s1537_s24 = scalar_lea.vmem (!%p206_p10), [#allocation2], %s1059_s22  ;;  %s1109_s26 = sshll.u32 (!%p206_p10), %s1316_s18, 10 }
  0x11   : > { %s1631_s7 = scalar_lea.hbm (!%p206_p10), %s1735_s2, %s1109_s26 }
  0x16   : > { %s260_s29 = scalar_select %p259_p11, %s1316_s18, 1 }
  0x17   : > { %s1327_s18 = smov [#allocation2]  }
  0x18   : > { %s1412_s30 = sshll.u32 %s260_s29, 6  ;;  %s1106_s5 = sshll.u32 %s260_s29, 5 }
  0x19   : > { %s1418_s8 = scalar_lea.vmem %s1733_s0, %s1412_s30  ;;  %s282_s11 = scalar_lea.vmem %s1736_s3, %s1412_s30 }
  0x1a   : > { %v1425_v0 = vld [vmem:[%s1418_s8] sm:$0xff]  ;;  %588 = vst.msk [vmem:[%s282_s11] sm:$0xff] %vm587_vm0, %v1326_v1  ;;  %589 = vst.msk [vmem:[%s282_s11 + $0x8] sm:$0xff] %vm587_vm0, %v1326_v1  ;;  %v1436_v2 = vld [vmem:[%s1418_s8 + $0x8] sm:$0xff]  ;;  %s272_s14 = scalar_lea.vmem %s1734_s1, %s1106_s5  ;;  %s881_s29 = sshll.u32 %s1537_s24, 4  ;;  %s1633_s29 = int_to_ptr.vmem [resolvable:$true] %s881_s29 }
  0x1b   : > { %590 = vst.msk [vmem:[%s282_s11 + $0x10] sm:$0xff] %vm587_vm0, %v1326_v1  ;;  %591 = vst.msk [vmem:[%s282_s11 + $0x18] sm:$0xff] %vm587_vm0, %v1326_v1  ;;  %v1439_v3 = vld [vmem:[%s1418_s8 + $0x20] sm:$0xff]  ;;  %v306_v4 = vmul.f32 %v1425_v0, %v1425_v0  ;;  %v307_v5 = vmul.f32 %v1436_v2, %v1436_v2  ;;  %v1451_v7 = vld [vmem:[%s1418_s8 + $0x28] sm:$0xff]  ;;  %s1246_s9 = scalar_lea.vmem %s1633_s29, 1024  ;;  %s1250_s10 = sshll.u32 %s1327_s18, 4  ;;  %s1251_s10 = int_to_ptr.vmem [resolvable:$false] %s1250_s10 }
  0x1c   : > { %592 = vst.msk [vmem:[%s282_s11 + $0x20] sm:$0xff] %vm587_vm0, %v1326_v1  ;;  %593 = vst.msk [vmem:[%s282_s11 + $0x28] sm:$0xff] %vm587_vm0, %v1326_v1  ;;  %v310_v6 = vmul.f32 %v1439_v3, %v1439_v3  ;;  %v1454_v8 = vld [vmem:[%s1418_s8 + $0x10] sm:$0xff]  ;;  %v311_v10 = vmul.f32 %v1451_v7, %v1451_v7  ;;  %v302_v11 = vld [vmem:[%s272_s14] sm:$0xff]  ;;  %p1247_p12 = scmp.ne.s32.totalorder %s1633_s29, %s1246_s9  ;;  %p1253_p1 = scmp.lt.s32.totalorder %s1633_s29, %s1251_s10 }
  0x1d   : > { %594 = vst.msk [vmem:[%s282_s11 + $0x30] sm:$0xff] %vm587_vm0, %v1326_v1  ;;  %595 = vst.msk [vmem:[%s282_s11 + $0x38] sm:$0xff] %vm587_vm0, %v1326_v1  ;;  %v1457_v9 = vld [vmem:[%s1418_s8 + $0x30] sm:$0xff]  ;;  %v315_v12 = vsel %vm314_vm1, %v306_v4, 0.0  ;;  %v318_v13 = vsel %vm314_vm1, %v307_v5, 0.0  ;;  %v303_v14 = vld [vmem:[%s272_s14 + $0x8] sm:$0xff]  ;;  %v308_v18 = vmul.f32 %v1454_v8, %v1454_v8  ;;  %v347_v22 = vmul.f32 %v302_v11, %v302_v11 }
  0x1e   : > { %v304_v15 = vld [vmem:[%s272_s14 + $0x10] sm:$0xff]  ;;  %v305_v16 = vld [vmem:[%s272_s14 + $0x18] sm:$0xff]  ;;  %316 = vadd.xlane.f32.xlu0 %v315_v12  ;;  %319 = vadd.xlane.f32.xlu1 %v318_v13  ;;  %v327_v17 = vsel %vm314_vm1, %v310_v6, 0.0  ;;  %v312_v19 = vmul.f32 %v1457_v9, %v1457_v9  ;;  %v330_v20 = vsel %vm314_vm1, %v311_v10, 0.0  ;;  %v348_v23 = vmul.f32 %v303_v14, %v303_v14  ;;  %p1248_p13 = pnand %p1247_p12, %p1395_p4  ;;  %s1252_s11 = scalar_lea.vmem %s1251_s10, 2048 }
  0x1f   : > { %v1470_v21 = vld [vmem:[%s1418_s8 + $0x18] sm:$0xff]  ;;  %v349_v24 = vmul.f32 %v304_v15, %v304_v15  ;;  %v350_v26 = vmul.f32 %v305_v16, %v305_v16  ;;  %v352_v27 = vsel %vm351_vm2, %v347_v22, 0.0  ;;  %v321_v32 = vsel %vm314_vm1, %v308_v18, 0.0  ;;  %p1254_p2 = scmp.lt.s32.totalorder %s1252_s11, %s1246_s9 }
  0x20   : > { %v1473_v25 = vld [vmem:[%s1418_s8 + $0x38] sm:$0xff]  ;;  %v353_v28 = vsel %vm351_vm2, %v348_v23, 0.0  ;;  %v309_v30 = vmul.f32 %v1470_v21, %v1470_v21  ;;  %v333_v33 = vsel %vm314_vm1, %v312_v19, 0.0  ;;  %s1637_s8 = scalar_lea.sflag [#allocation3], %s233_s21  ;;  %p1249_p0 = pneg %p1248_p13 }
  0x21   : > { %v355_v29 = vsel %vm351_vm2, %v349_v24, 0.0  ;;  %v354_v31 = vadd.f32 %v353_v28, %v352_v27  ;;  %v313_v34 = vmul.f32 %v1473_v25, %v1473_v25  ;;  %v357_v35 = vsel %vm351_vm2, %v350_v26, 0.0  ;;  %p1255_p3 = por %p1254_p2, %p1253_p1 }
  0x22   : > { %328 = vadd.xlane.f32.xlu0 %v327_v17  ;;  %331 = vadd.xlane.f32.xlu1 %v330_v20  ;;  %v324_v38 = vsel %vm314_vm1, %v309_v30, 0.0 }
  0x23   : > { %v356_v36 = vadd.f32 %v355_v29, %v354_v31  ;;  %v336_v39 = vsel %vm314_vm1, %v313_v34, 0.0  ;;  %p1256_p5 = pnand %p1255_p3, %p1249_p0 }
  0x25   : > { %v358_v37 = vadd.f32 %v357_v35, %v356_v36 }
  0x26   : > { %322 = vadd.xlane.f32.xlu0 %v321_v32  ;;  %334 = vadd.xlane.f32.xlu1 %v333_v33 }
  0x27   : > { %v359_v40 = vrot.slane %v358_v37, 4 }
  0x29   : > { %v360_v41 = vadd.f32 %v359_v40, %v358_v37 }
  0x2a   : > { %325 = vadd.xlane.f32.xlu0 %v324_v38  ;;  %337 = vadd.xlane.f32.xlu1 %v336_v39 }
  0x2b   : > { %v361_v42 = vrot.slane %v360_v41, 2 }
  0x2d   : > { %v362_v43 = vadd.f32 %v361_v42, %v360_v41 }
  0x2f   : > { %v363_v44 = vrot.slane %v362_v43, 1 }
  0x31   : > { %v364_v45 = vadd.f32 %v363_v44, %v362_v43 }
  0x33   : > { %1212 = vrsqrt.f32 %v364_v45 }
  0x3d   : > { %v1213_v46 = vpop.eup %1212 }
  0x3e   : > { %v374_v47 = vmul.f32 %v1213_v46, %v302_v11  ;;  %v375_v48 = vmul.f32 %v1213_v46, %v303_v14  ;;  %v376_v49 = vmul.f32 %v1213_v46, %v304_v15  ;;  %v377_v50 = vmul.f32 %v1213_v46, %v305_v16 }
  0x40   : > { %v1142_v51 = vpack.c.bf16 %v375_v48, %v374_v47  ;;  %v1146_v52 = vpack.c.bf16 %v377_v50, %v376_v49 }
  0x42   : > { %1143 = vmatprep.subr.bf16.mxu0 %v1142_v51  ;;  %1150 = vmatprep.subr.bf16.mxu1 %v1142_v51 }
  0x43   : > { %1145 = vmatpush3.bf16.msra.mxu0 %v1142_v51  ;;  %1152 = vmatpush3.bf16.msra.mxu1 %v1142_v51 }
  0x44   : > { %1147 = vmatprep.subr.bf16.mxu0 %v1146_v52  ;;  %1151 = vmatprep.subr.bf16.mxu1 %v1146_v52 }
  0x47   : > { %1149 = vmatpush3.bf16.msra.mxu0 %v1146_v52  ;;  %1153 = vmatpush3.bf16.msra.mxu1 %v1146_v52 }
  0xab   : > { %v317_v53 = vpop.xlane.xlu0 %316  ;;  %v320_v54 = vpop.xlane.xlu1 %319 }
  0xac   : > { %1214 = vrsqrt.f32 %v317_v53 }
  0xad   : > { %1216 = vrsqrt.f32 %v320_v54 }
  0xaf   : > { %v329_v55 = vpop.xlane.xlu0 %328  ;;  %v332_v56 = vpop.xlane.xlu1 %331 }
  0xb0   : > { %1218 = vrsqrt.f32 %v329_v55 }
  0xb1   : > { %1220 = vrsqrt.f32 %v332_v56 }
  0xb3   : > { %v323_v57 = vpop.xlane.xlu0 %322  ;;  %v335_v58 = vpop.xlane.xlu1 %334 }
  0xb4   : > { %1222 = vrsqrt.f32 %v323_v57 }
  0xb5   : > { %1224 = vrsqrt.f32 %v335_v58 }
  0xb6   : > { %v1215_v59 = vpop.eup %1214 }
  0xb7   : > { %v1217_v60 = vpop.eup %1216  ;;  %v326_v61 = vpop.xlane.xlu0 %325  ;;  %v366_v62 = vmul.f32 %v1215_v59, %v1425_v0 }
  0xb8   : > { %v338_v63 = vpop.xlane.xlu1 %337  ;;  %1226 = vrsqrt.f32 %v326_v61  ;;  %v367_v1 = vmul.f32 %v1217_v60, %v1436_v2  ;;  %v596_v61 = vlaneseq }
  0xb9   : > { %1130 = vmatprep.mubr.msk.f32.mxu0 %vm314_vm1, %v366_v62  ;;  %1228 = vrsqrt.f32 %v338_v63 }
  0xba   : > { %v1219_v4 = vpop.eup %1218  ;;  %1131 = vmatmul.mubr.msk.f32.vlgmr.msra.gmra.mrb[0].mxu0 %vm314_vm1, %v367_v1  ;;  %v1524_v62 = vand.u32 127, %v596_v61 }
  0xbb   : > { %v1221_v5 = vpop.eup %1220  ;;  %v370_v6 = vmul.f32 %v1219_v4, %v1439_v3 }
  0xbc   : > { %v371_v10 = vmul.f32 %v1221_v5, %v1451_v7 }
  0xbd   : > { %1136 = vmatprep.mubr.msk.f32.mxu1 %vm314_vm1, %v370_v6 }
  0xbe   : > { %v1223_v11 = vpop.eup %1222  ;;  %1137 = vmatmul.mubr.msk.f32.vlgmr.msra.gmra.mrb[0].mxu1 %vm314_vm1, %v371_v10 }
  0xbf   : > { %v1225_v0 = vpop.eup %1224  ;;  %v368_v12 = vmul.f32 %v1223_v11, %v1454_v8 }
  0xc0   : > { %v372_v2 = vmul.f32 %v1225_v0, %v1457_v9 }
  0xc1   : > { %1133 = vmatprep.mubr.msk.f32.mxu0 %vm314_vm1, %v368_v12 }
  0xc2   : > { %v1227_v13 = vpop.eup %1226  ;;  %1139 = vmatprep.mubr.msk.f32.mxu1 %vm314_vm1, %v372_v2 }
  0xc3   : > { %v1229_v14 = vpop.eup %1228  ;;  %v369_v3 = vmul.f32 %v1227_v13, %v1470_v21 }
  0xc4   : > { %v373_v7 = vmul.f32 %v1229_v14, %v1473_v25 }
  0xc5   : > { %1134 = vmatmul.mubr.msk.f32.gmra.mrb[2].mxu0 %vm314_vm1, %v369_v3 }
  0xc6   : > { %1140 = vmatmul.mubr.msk.f32.gmra.mrb[2].mxu1 %vm314_vm1, %v373_v7 }
 0x18d   : > { %v1132_v15 = vpop.f32.mrb[0].mxu0 }
 0x18e   : > { %v1077_v16 = vadd.f32 -1.0, %v1132_v15  ;;  %v468_v17 = vpop.f32.mrb[1].mxu0 }
 0x18f   : > { %v1076_v8 = vadd.f32 -1.0, %v468_v17 }
 0x190   : > { %v516_v18 = vmul.f32 10.0, %v1077_v16 }
 0x191   : > { %v515_v9 = vmul.f32 10.0, %v1076_v8  ;;  %v1138_v19 = vpop.f32.mrb[0].mxu1 }
 0x192   : > { %v525_v20 = vmul.f32 1.442695, %v516_v18  ;;  %v1081_v22 = vadd.f32 -1.0, %v1138_v19  ;;  %v488_v23 = vpop.f32.mrb[1].mxu1 }
 0x193   : > { %v523_v24 = vmul.f32 1.442695, %v515_v9  ;;  %v1080_v26 = vadd.f32 -1.0, %v488_v23 }
 0x194   : > { %1230 = vpow2.f32 %v525_v20  ;;  %v520_v21 = vmul.f32 10.0, %v1081_v22 }
 0x195   : > { %1232 = vpow2.f32 %v523_v24  ;;  %v519_v25 = vmul.f32 10.0, %v1080_v26 }
 0x196   : > { %v533_v27 = vmul.f32 1.442695, %v520_v21 }
 0x197   : > { %v531_v28 = vmul.f32 1.442695, %v519_v25 }
 0x198   : > { %1234 = vpow2.f32 %v533_v27  ;;  %v1135_v29 = vpop.f32.mrb[2].mxu0 }
 0x199   : > { %1236 = vpow2.f32 %v531_v28  ;;  %v1079_v30 = vadd.f32 -1.0, %v1135_v29  ;;  %v478_v31 = vpop.f32.mrb[3].mxu0  ;;  %v1141_v32 = vpop.f32.mrb[2].mxu1 }
 0x19a   : > { %v1078_v33 = vadd.f32 -1.0, %v478_v31  ;;  %v1083_v34 = vadd.f32 -1.0, %v1141_v32  ;;  %v498_v35 = vpop.f32.mrb[3].mxu1 }
 0x19b   : > { %v518_v36 = vmul.f32 10.0, %v1079_v30  ;;  %v1082_v37 = vadd.f32 -1.0, %v498_v35 }
 0x19c   : > { %v517_v38 = vmul.f32 10.0, %v1078_v33  ;;  %v522_v39 = vmul.f32 10.0, %v1083_v34 }
 0x19d   : > { %v529_v40 = vmul.f32 1.442695, %v518_v36  ;;  %v521_v41 = vmul.f32 10.0, %v1082_v37 }
 0x19e   : > { %v1231_v42 = vpop.eup %1230  ;;  %v527_v43 = vmul.f32 1.442695, %v517_v38  ;;  %v537_v44 = vmul.f32 1.442695, %v522_v39 }
 0x19f   : > { %v1233_v45 = vpop.eup %1232  ;;  %1238 = vpow2.f32 %v529_v40  ;;  %v535_v46 = vmul.f32 1.442695, %v521_v41  ;;  %v542_v47 = vsel %vm351_vm2, %v1231_v42, -inf }
 0x1a0   : > { %1240 = vpow2.f32 %v527_v43  ;;  %543 = vmax.xlane.f32.xlu1 %v542_v47  ;;  %v539_v48 = vsel %vm351_vm2, %v1233_v45, -inf }
 0x1a1   : > { %1242 = vpow2.f32 %v537_v44  ;;  %540 = vmax.xlane.f32.xlu0 %v539_v48 }
 0x1a2   : > { %v1235_v49 = vpop.eup %1234  ;;  %1244 = vpow2.f32 %v535_v46 }
 0x1a3   : > { %v1237_v50 = vpop.eup %1236  ;;  %v554_v51 = vsel %vm351_vm2, %v1235_v49, -inf }
 0x1a4   : > { %555 = vmax.xlane.f32.xlu1 %v554_v51  ;;  %v551_v52 = vsel %vm351_vm2, %v1237_v50, -inf }
 0x1a5   : > { %552 = vmax.xlane.f32.xlu0 %v551_v52 }
 0x1a9   : > { %v1507_v53 = vpop.eup %1238 }
 0x1aa   : > { %v1509_v54 = vpop.eup %1240  ;;  %v548_v55 = vsel %vm351_vm2, %v1507_v53, -inf }
 0x1ab   : > { %v1513_v56 = vpop.eup %1242  ;;  %549 = vmax.xlane.f32.xlu1 %v548_v55  ;;  %v545_v57 = vsel %vm351_vm2, %v1509_v54, -inf }
 0x1ac   : > { %v1517_v58 = vpop.eup %1244  ;;  %546 = vmax.xlane.f32.xlu0 %v545_v57  ;;  %v560_v59 = vsel %vm351_vm2, %v1513_v56, -inf }
 0x1ad   : > { %v557_v60 = vsel %vm351_vm2, %v1517_v58, -inf }
 0x1af   : > { %561 = vmax.xlane.f32.xlu1 %v560_v59 }
 0x1b0   : > { %558 = vmax.xlane.f32.xlu0 %v557_v60 }
 0x22d   : > { %v544_v63 = vpop.xlane.xlu1 %543 }
 0x22e   : > { %v564_v1 = vsub.f32 %v1231_v42, %v544_v63  ;;  %vm599_vm3 = vcmp.eq.f32.partialorder %v1231_v42, %v544_v63  ;;  %v541_v4 = vpop.xlane.xlu0 %540 }
 0x22f   : > { %v607_v5 = vsel %vm599_vm3, %v1524_v62, 64  ;;  %v563_v6 = vsub.f32 %v1233_v45, %v541_v4  ;;  %vm598_vm4 = vcmp.eq.f32.partialorder %v1233_v45, %v541_v4 }
 0x230   : > { %v572_v10 = vmul.f32 10.0, %v564_v1  ;;  %v606_v11 = vsel %vm598_vm4, %v1524_v62, 64  ;;  %v1531_v0 = vsel %vm351_vm2, %v607_v5, 2147483647 }
 0x231   : > { %v571_v12 = vmul.f32 10.0, %v563_v6  ;;  %v556_v2 = vpop.xlane.xlu1 %555  ;;  %v631_v13 = vshra.s32 %v1531_v0, 16  ;;  %v1535_v14 = vsel %vm351_vm2, %v606_v11, 2147483647  ;;  %v630_v55 = vand.u32 65535, %v1531_v0 }
 0x232   : > { %580 = vst.msk [vmem:[%s1537_s24 + $0x8] sm:$0xff] %vm351_vm2, %v572_v10  ;;  %v568_v3 = vsub.f32 %v1235_v49, %v556_v2  ;;  %vm603_vm5 = vcmp.eq.f32.partialorder %v1235_v49, %v556_v2  ;;  %v553_v7 = vpop.xlane.xlu0 %552  ;;  %v616_v15 = vshra.s32 %v1535_v14, 16 }
 0x233   : > { %579 = vst.msk [vmem:[%s1537_s24] sm:$0xff] %vm351_vm2, %v571_v12  ;;  %v611_v16 = vsel %vm603_vm5, %v1524_v62, 64  ;;  %v567_v17 = vsub.f32 %v1237_v50, %v553_v7  ;;  %vm602_vm6 = vcmp.eq.f32.partialorder %v1237_v50, %v553_v7  ;;  %v1545_v8 = vcvt.s32.f32 %v631_v13 }
 0x234   : > { %v576_v18 = vmul.f32 10.0, %v568_v3  ;;  %v610_v9 = vsel %vm602_vm6, %v1524_v62, 64  ;;  %v1548_v19 = vcvt.s32.f32 %v616_v15  ;;  %v1551_v20 = vsel %vm351_vm2, %v611_v16, 2147483647 }
 0x235   : > { %v575_v22 = vmul.f32 10.0, %v567_v17  ;;  %634 = vmin.xlane.f32.xlu1 %v1545_v8  ;;  %v691_v23 = vshra.s32 %v1551_v20, 16  ;;  %v1556_v24 = vsel %vm351_vm2, %v610_v9, 2147483647  ;;  %v690_v59 = vand.u32 65535, %v1551_v20 }
 0x236   : > { %584 = vst.msk [vmem:[%s1537_s24 + $0x28] sm:$0xff] %vm351_vm2, %v576_v18  ;;  %619 = vmin.xlane.f32.xlu0 %v1548_v19  ;;  %v676_v26 = vshra.s32 %v1556_v24, 16 }
 0x237   : > { %583 = vst.msk [vmem:[%s1537_s24 + $0x20] sm:$0xff] %vm351_vm2, %v575_v22  ;;  %v1564_v21 = vcvt.s32.f32 %v691_v23  ;;  %v692_v5 = vcvt.s32.f32 %v690_v59 }
 0x238   : > { %v550_v25 = vpop.xlane.xlu1 %549  ;;  %v1566_v27 = vcvt.s32.f32 %v676_v26 }
 0x239   : > { %v566_v28 = vsub.f32 %v1507_v53, %v550_v25  ;;  %vm601_vm7 = vcmp.eq.f32.partialorder %v1507_v53, %v550_v25  ;;  %694 = vmin.xlane.f32.xlu1 %v1564_v21  ;;  %v547_v29 = vpop.xlane.xlu0 %546 }
 0x23a   : > { %v609_v30 = vsel %vm601_vm7, %v1524_v62, 64  ;;  %v565_v31 = vsub.f32 %v1509_v54, %v547_v29  ;;  %vm600_vm8 = vcmp.eq.f32.partialorder %v1509_v54, %v547_v29  ;;  %679 = vmin.xlane.f32.xlu0 %v1566_v27 }
 0x23b   : > { %v574_v32 = vmul.f32 10.0, %v566_v28  ;;  %v608_v33 = vsel %vm600_vm8, %v1524_v62, 64  ;;  %v659_v34 = vsel %vm351_vm2, %v609_v30, 2147483647 }
 0x23c   : > { %v573_v35 = vmul.f32 10.0, %v565_v31  ;;  %v562_v36 = vpop.xlane.xlu1 %561  ;;  %v661_v37 = vshra.s32 %v659_v34, 16  ;;  %v644_v38 = vsel %vm351_vm2, %v608_v33, 2147483647  ;;  %v660_v12 = vand.u32 65535, %v659_v34 }
 0x23d   : > { %582 = vst.msk [vmem:[%s1537_s24 + $0x18] sm:$0xff] %vm351_vm2, %v574_v32  ;;  %v570_v39 = vsub.f32 %v1513_v56, %v562_v36  ;;  %vm605_vm9 = vcmp.eq.f32.partialorder %v1513_v56, %v562_v36  ;;  %v559_v40 = vpop.xlane.xlu0 %558  ;;  %v646_v41 = vshra.s32 %v644_v38, 16  ;;  %v615_v56 = vand.u32 65535, %v1535_v14 }
 0x23e   : > { %581 = vst.msk [vmem:[%s1537_s24 + $0x10] sm:$0xff] %vm351_vm2, %v573_v35  ;;  %v613_v42 = vsel %vm605_vm9, %v1524_v62, 64  ;;  %v569_v43 = vsub.f32 %v1517_v58, %v559_v40  ;;  %vm604_vm10 = vcmp.eq.f32.partialorder %v1517_v58, %v559_v40  ;;  %v663_v44 = vcvt.s32.f32 %v661_v37 }
 0x23f   : > { %v578_v45 = vmul.f32 10.0, %v570_v39  ;;  %v612_v46 = vsel %vm604_vm10, %v1524_v62, 64  ;;  %v648_v47 = vcvt.s32.f32 %v646_v41  ;;  %v719_v48 = vsel %vm351_vm2, %v613_v42, 2147483647 }
 0x240   : > { %v577_v49 = vmul.f32 10.0, %v569_v43  ;;  %664 = vmin.xlane.f32.xlu1 %v663_v44  ;;  %v721_v50 = vshra.s32 %v719_v48, 16  ;;  %v704_v51 = vsel %vm351_vm2, %v612_v46, 2147483647  ;;  %v632_v58 = vcvt.s32.f32 %v630_v55 }
 0x241   : > { %586 = vst.msk [vmem:[%s1537_s24 + $0x38] sm:$0xff] %vm351_vm2, %v578_v45  ;;  %649 = vmin.xlane.f32.xlu0 %v648_v47  ;;  %v706_v52 = vshra.s32 %v704_v51, 16  ;;  %v617_v61 = vcvt.s32.f32 %v615_v56  ;;  %v675_v62 = vand.u32 65535, %v1556_v24  ;;  %v645_v2 = vand.u32 65535, %v644_v38 }
 0x242   : > { %585 = vst.msk [vmem:[%s1537_s24 + $0x30] sm:$0xff] %vm351_vm2, %v577_v49  ;;  %v723_v53 = vcvt.s32.f32 %v721_v50  ;;  %v662_v14 = vcvt.s32.f32 %v660_v12  ;;  %v720_v3 = vand.u32 65535, %v719_v48  ;;  %v705_v16 = vand.u32 65535, %v704_v51 }
 0x243   : > { %v708_v54 = vcvt.s32.f32 %v706_v52  ;;  %v677_v10 = vcvt.s32.f32 %v675_v62  ;;  %v647_v15 = vcvt.s32.f32 %v645_v2 }
 0x244   : > { %724 = vmin.xlane.f32.xlu1 %v723_v53  ;;  %v722_v9 = vcvt.s32.f32 %v720_v3  ;;  %v707_v20 = vcvt.s32.f32 %v705_v16 }
 0x245   : > { %709 = vmin.xlane.f32.xlu0 %v708_v54 }
 0x2c2   : > { %v1596_v57 = vpop.xlane.xlu1 %634 }
 0x2c3   : > { %v1599_v60 = vpop.xlane.xlu0 %619  ;;  %vm636_vm11 = vcmp.eq.f32.partialorder %v1545_v8, %v1596_v57 }
 0x2c4   : > { %v637_v63 = vsel %vm636_vm11, %v632_v58, inf  ;;  %vm621_vm12 = vcmp.eq.f32.partialorder %v1548_v19, %v1599_v60 }
 0x2c5   : > { %638 = vmin.xlane.f32.xlu1 %v637_v63  ;;  %v622_v1 = vsel %vm621_vm12, %v617_v61, inf }
 0x2c6   : > { %v1606_v4 = vpop.xlane.xlu1 %694  ;;  %623 = vmin.xlane.f32.xlu0 %v622_v1 }
 0x2c7   : > { %v1608_v6 = vpop.xlane.xlu0 %679  ;;  %vm696_vm13 = vcmp.eq.f32.partialorder %v1564_v21, %v1606_v4 }
 0x2c8   : > { %v697_v11 = vsel %vm696_vm13, %v692_v5, inf  ;;  %vm681_vm14 = vcmp.eq.f32.partialorder %v1566_v27, %v1608_v6 }
 0x2c9   : > { %698 = vmin.xlane.f32.xlu1 %v697_v11  ;;  %v682_v0 = vsel %vm681_vm14, %v677_v10, inf }
 0x2ca   : > { %683 = vmin.xlane.f32.xlu0 %v682_v0 }
 0x2cd   : > { %v1614_v13 = vpop.xlane.xlu1 %664 }
 0x2ce   : > { %v1616_v7 = vpop.xlane.xlu0 %649  ;;  %vm666_vm15 = vcmp.eq.f32.partialorder %v663_v44, %v1614_v13 }
 0x2cf   : > { %v667_v17 = vsel %vm666_vm15, %v662_v14, inf  ;;  %vm651_vm1 = vcmp.eq.f32.partialorder %v648_v47, %v1616_v7 }
 0x2d0   : > { %668 = vmin.xlane.f32.xlu1 %v667_v17  ;;  %v652_v8 = vsel %vm651_vm1, %v647_v15, inf }
 0x2d1   : > { %v1620_v18 = vpop.xlane.xlu1 %724  ;;  %653 = vmin.xlane.f32.xlu0 %v652_v8 }
 0x2d2   : > { %v1622_v19 = vpop.xlane.xlu0 %709  ;;  %vm726_vm2 = vcmp.eq.f32.partialorder %v723_v53, %v1620_v18 }
 0x2d3   : > { %v727_v22 = vsel %vm726_vm2, %v722_v9, inf  ;;  %vm711_vm3 = vcmp.eq.f32.partialorder %v708_v54, %v1622_v19 }
 0x2d4   : > { %728 = vmin.xlane.f32.xlu1 %v727_v22  ;;  %v712_v23 = vsel %vm711_vm3, %v707_v20, inf }
 0x2d5   : > { %713 = vmin.xlane.f32.xlu0 %v712_v23 }
 0x2d6   : > { %1259 = shalt.err (!%p1256_p5)
}
 0x2d7   : > { %s1260_s12 = scalar_lea.hbm %s1631_s7, 1024  ;;  %s1264_s21 = scalar_lea.hbm %s1735_s2, 2048 }
 0x2d8   : > { %p1261_p6 = scmp.ne.s32.totalorder %s1631_s7, %s1260_s12  ;;  %p1265_p10 = scmp.lt.u32.totalorder %s1631_s7, %s1735_s2 }
 0x2d9   : > { %p1266_p11 = scmp.lt.u32.totalorder %s1264_s21, %s1260_s12  ;;  %p1268_p13 = scmp.lt.u32.totalorder %s1260_s12, %s1631_s7 }
 0x2da   : > { %p1262_p7 = pnand %p1261_p6, %p1395_p4 }
 0x2db   : > { %p1267_p12 = por %p1266_p11, %p1265_p10 }
 0x2dc   : > { %p1263_p9 = pneg %p1262_p7 }
 0x2dd   : > { %p1269_p0 = por %p1268_p13, %p1267_p12 }
 0x2df   : > { %p1270_p1 = pnand %p1269_p0, %p1263_p9 }
 0x2e1   : > { %1273 = shalt.err (!%p1270_p1)
}
 0x2e2   : > { %s1328_s26 = smov 128   ;;  %s1329_s5 = smov 8   ;;  %v641_v24 = vcvt.f32.s32 %v1596_v57  ;;  %v626_v26 = vcvt.f32.s32 %v1599_v60  ;;  %v701_v21 = vcvt.f32.s32 %v1606_v4  ;;  %v686_v25 = vcvt.f32.s32 %v1608_v6 }
 0x2e3   : > { %1154 = dma.vmem_to_hbm [thread:$0]  (%p1395_p4), %s1633_s29, 1024, %s1631_s7, %s1637_s8, %s1328_s26, %s1328_s26, %s1329_s5   ;;  %v671_v29 = vcvt.f32.s32 %v1614_v13  ;;  %v656_v33 = vcvt.f32.s32 %v1616_v7  ;;  %v731_v35 = vcvt.f32.s32 %v1620_v18  ;;  %v716_v39 = vcvt.f32.s32 %v1622_v19 }
 0x2e4   : > { %v642_v28 = vshll.u32 %v641_v24, 16  ;;  %v627_v32 = vshll.u32 %v626_v26, 16  ;;  %v702_v37 = vshll.u32 %v701_v21, 16  ;;  %v687_v38 = vshll.u32 %v686_v25, 16  ;;  %s1681_s6 = scalar_lea.vmem %s1737_s4, %s1412_s30 }
 0x2e5   : > { %v1669_v42 = vshll.u32 %v671_v29, 16  ;;  %v1671_v47 = vshll.u32 %v656_v33, 16  ;;  %v1673_v51 = vshll.u32 %v731_v35, 16  ;;  %vm838_vm4 = vcmask 15360  }
 0x2e6   : > { %v1675_v55 = vshll.u32 %v716_v39, 16 }
 0x352   : > { %v639_v27 = vpop.xlane.xlu1 %638 }
 0x353   : > { %v640_v30 = vcvt.f32.s32 %v639_v27  ;;  %v624_v31 = vpop.xlane.xlu0 %623 }
 0x354   : > { %v625_v34 = vcvt.f32.s32 %v624_v31 }
 0x355   : > { %v643_v36 = vadd.s32 %v642_v28, %v640_v30 }
 0x356   : > { %v628_v40 = vadd.s32 %v627_v32, %v625_v34  ;;  %v699_v41 = vpop.xlane.xlu1 %698 }
 0x357   : > { %v735_v43 = vshra.s32 %v643_v36, 3  ;;  %v751_v44 = vand.u32 7, %v643_v36  ;;  %v700_v45 = vcvt.f32.s32 %v699_v41  ;;  %v684_v46 = vpop.xlane.xlu0 %683 }
 0x358   : > { %v734_v48 = vshra.s32 %v628_v40, 3  ;;  %v750_v49 = vand.u32 7, %v628_v40  ;;  %v685_v50 = vcvt.f32.s32 %v684_v46 }
 0x359   : > { %v743_v52 = vcvt.s32.f32 %v735_v43  ;;  %v759_v53 = vcvt.s32.f32 %v751_v44  ;;  %v703_v54 = vadd.s32 %v702_v37, %v700_v45 }
 0x35a   : > { %v742_v56 = vcvt.s32.f32 %v734_v48  ;;  %v758_v57 = vcvt.s32.f32 %v750_v49  ;;  %v688_v58 = vadd.s32 %v687_v38, %v685_v50 }
 0x35b   : > { %v767_v59 = vmul.f32 2.0, %v759_v53  ;;  %v799_v60 = vmul.f32 2.0, %v743_v52  ;;  %v739_v61 = vshra.s32 %v703_v54, 3  ;;  %v755_v62 = vand.u32 7, %v703_v54 }
 0x35c   : > { %v766_v63 = vmul.f32 2.0, %v758_v57  ;;  %v798_v1 = vmul.f32 2.0, %v742_v56  ;;  %v738_v4 = vshra.s32 %v688_v58, 3  ;;  %v754_v5 = vand.u32 7, %v688_v58 }
 0x35d   : > { %v775_v6 = vadd.f32 1.0, %v767_v59  ;;  %v807_v10 = vadd.f32 1.0, %v799_v60  ;;  %v747_v11 = vcvt.s32.f32 %v739_v61  ;;  %v763_v0 = vcvt.s32.f32 %v755_v62  ;;  %v669_v12 = vpop.xlane.xlu1 %668 }
 0x35e   : > { %v774_v2 = vadd.f32 1.0, %v766_v63  ;;  %v806_v13 = vadd.f32 1.0, %v798_v1  ;;  %v746_v14 = vcvt.s32.f32 %v738_v4  ;;  %v762_v3 = vcvt.s32.f32 %v754_v5  ;;  %v654_v7 = vpop.xlane.xlu0 %653 }
 0x35f   : > { %v783_v15 = vmul.f32 0.125, %v775_v6  ;;  %v815_v16 = vmul.f32 0.125, %v807_v10  ;;  %v771_v17 = vmul.f32 2.0, %v763_v0  ;;  %v803_v8 = vmul.f32 2.0, %v747_v11 }
 0x360   : > { %v782_v18 = vmul.f32 0.125, %v774_v2  ;;  %v814_v9 = vmul.f32 0.125, %v806_v13  ;;  %v770_v19 = vmul.f32 2.0, %v762_v3  ;;  %v802_v20 = vmul.f32 2.0, %v746_v14 }
 0x361   : > { %v1085_v22 = vadd.f32 -1.0, %v783_v15  ;;  %v1093_v23 = vadd.f32 -1.0, %v815_v16  ;;  %v779_v24 = vadd.f32 1.0, %v771_v17  ;;  %v811_v26 = vadd.f32 1.0, %v803_v8  ;;  %v729_v29 = vpop.xlane.xlu1 %728 }
 0x362   : > { %v1084_v21 = vadd.f32 -1.0, %v782_v18  ;;  %v1092_v25 = vadd.f32 -1.0, %v814_v9  ;;  %v778_v27 = vadd.f32 1.0, %v770_v19  ;;  %v810_v28 = vadd.f32 1.0, %v802_v20  ;;  %v714_v34 = vpop.xlane.xlu0 %713 }
 0x363   : > { %v831_v30 = vsel %vm587_vm0, %v1085_v22, %v1093_v23  ;;  %v787_v31 = vmul.f32 0.125, %v779_v24  ;;  %v819_v32 = vmul.f32 0.125, %v811_v26  ;;  %v670_v33 = vcvt.f32.s32 %v669_v12 }
 0x364   : > { %840 = vst.msk [vmem:[%s1681_s6 + $0x8] sm:$0xff] %vm838_vm4, %v831_v30  ;;  %v830_v35 = vsel %vm587_vm0, %v1084_v21, %v1092_v25  ;;  %v786_v36 = vmul.f32 0.125, %v778_v27  ;;  %v818_v37 = vmul.f32 0.125, %v810_v28  ;;  %v655_v38 = vcvt.f32.s32 %v654_v7 }
 0x365   : > { %839 = vst.msk [vmem:[%s1681_s6] sm:$0xff] %vm838_vm4, %v830_v35  ;;  %v1089_v39 = vadd.f32 -1.0, %v787_v31  ;;  %v1097_v40 = vadd.f32 -1.0, %v819_v32  ;;  %v673_v41 = vadd.s32 %v1669_v42, %v670_v33  ;;  %v730_v43 = vcvt.f32.s32 %v729_v29 }
 0x366   : > { %v1088_v44 = vadd.f32 -1.0, %v786_v36  ;;  %v1096_v45 = vadd.f32 -1.0, %v818_v37  ;;  %v658_v46 = vadd.s32 %v1671_v47, %v655_v38  ;;  %v715_v48 = vcvt.f32.s32 %v714_v34 }
 0x367   : > { %v835_v49 = vsel %vm587_vm0, %v1089_v39, %v1097_v40  ;;  %v737_v50 = vshra.s32 %v673_v41, 3  ;;  %v753_v52 = vand.u32 7, %v673_v41  ;;  %v733_v53 = vadd.s32 %v1673_v51, %v730_v43 }
 0x368   : > { %844 = vst.msk [vmem:[%s1681_s6 + $0x28] sm:$0xff] %vm838_vm4, %v835_v49  ;;  %v834_v54 = vsel %vm587_vm0, %v1088_v44, %v1096_v45  ;;  %v736_v56 = vshra.s32 %v658_v46, 3  ;;  %v752_v57 = vand.u32 7, %v658_v46  ;;  %v718_v42 = vadd.s32 %v1675_v55, %v715_v48 }
 0x369   : > { %843 = vst.msk [vmem:[%s1681_s6 + $0x20] sm:$0xff] %vm838_vm4, %v834_v54  ;;  %v745_v58 = vcvt.s32.f32 %v737_v50  ;;  %v761_v59 = vcvt.s32.f32 %v753_v52  ;;  %v741_v47 = vshra.s32 %v733_v53, 3  ;;  %v757_v60 = vand.u32 7, %v733_v53 }
 0x36a   : > { %v744_v61 = vcvt.s32.f32 %v736_v56  ;;  %v760_v62 = vcvt.s32.f32 %v752_v57  ;;  %v740_v63 = vshra.s32 %v718_v42, 3  ;;  %v756_v1 = vand.u32 7, %v718_v42 }
 0x36b   : > { %v769_v4 = vmul.f32 2.0, %v761_v59  ;;  %v801_v51 = vmul.f32 2.0, %v745_v58  ;;  %v749_v5 = vcvt.s32.f32 %v741_v47  ;;  %v765_v6 = vcvt.s32.f32 %v757_v60 }
 0x36c   : > { %v768_v10 = vmul.f32 2.0, %v760_v62  ;;  %v800_v11 = vmul.f32 2.0, %v744_v61  ;;  %v748_v0 = vcvt.s32.f32 %v740_v63  ;;  %v764_v12 = vcvt.s32.f32 %v756_v1 }
 0x36d   : > { %v777_v2 = vadd.f32 1.0, %v769_v4  ;;  %v809_v55 = vadd.f32 1.0, %v801_v51  ;;  %v773_v13 = vmul.f32 2.0, %v765_v6  ;;  %v805_v14 = vmul.f32 2.0, %v749_v5 }
 0x36e   : > { %v776_v3 = vadd.f32 1.0, %v768_v10  ;;  %v808_v7 = vadd.f32 1.0, %v800_v11  ;;  %v772_v15 = vmul.f32 2.0, %v764_v12  ;;  %v804_v16 = vmul.f32 2.0, %v748_v0 }
 0x36f   : > { %v785_v17 = vmul.f32 0.125, %v777_v2  ;;  %v817_v8 = vmul.f32 0.125, %v809_v55  ;;  %v781_v18 = vadd.f32 1.0, %v773_v13  ;;  %v813_v9 = vadd.f32 1.0, %v805_v14 }
 0x370   : > { %v784_v19 = vmul.f32 0.125, %v776_v3  ;;  %v816_v20 = vmul.f32 0.125, %v808_v7  ;;  %v780_v22 = vadd.f32 1.0, %v772_v15  ;;  %v812_v23 = vadd.f32 1.0, %v804_v16 }
 0x371   : > { %v1087_v24 = vadd.f32 -1.0, %v785_v17  ;;  %v1095_v26 = vadd.f32 -1.0, %v817_v8  ;;  %v789_v21 = vmul.f32 0.125, %v781_v18  ;;  %v821_v25 = vmul.f32 0.125, %v813_v9 }
 0x372   : > { %v1086_v27 = vadd.f32 -1.0, %v784_v19  ;;  %v1094_v28 = vadd.f32 -1.0, %v816_v20  ;;  %v788_v29 = vmul.f32 0.125, %v780_v22  ;;  %v820_v30 = vmul.f32 0.125, %v812_v23 }
 0x373   : > { %v833_v31 = vsel %vm587_vm0, %v1087_v24, %v1095_v26  ;;  %v1091_v32 = vadd.f32 -1.0, %v789_v21  ;;  %v1099_v33 = vadd.f32 -1.0, %v821_v25 }
 0x374   : > { %842 = vst.msk [vmem:[%s1681_s6 + $0x18] sm:$0xff] %vm838_vm4, %v833_v31  ;;  %v832_v34 = vsel %vm587_vm0, %v1086_v27, %v1094_v28  ;;  %v1090_v35 = vadd.f32 -1.0, %v788_v29  ;;  %v1098_v36 = vadd.f32 -1.0, %v820_v30 }
 0x375   : > { %841 = vst.msk [vmem:[%s1681_s6 + $0x10] sm:$0xff] %vm838_vm4, %v832_v34  ;;  %v837_v37 = vsel %vm587_vm0, %v1091_v32, %v1099_v33 }
 0x376   : > { %846 = vst.msk [vmem:[%s1681_s6 + $0x38] sm:$0xff] %vm838_vm4, %v837_v37  ;;  %v836_v38 = vsel %vm587_vm0, %v1090_v35, %v1098_v36 }
 0x377   : > { %845 = vst.msk [vmem:[%s1681_s6 + $0x30] sm:$0xff] %vm838_vm4, %v836_v38 }
 0x378 PF: > { %p1160_p4 = scmp.ge.s32.totalorder %s1324_s20, 2  ;;  %s904_s30 = sand.u32 1, %s1304_s15  }
 0x379   : > { %s905_s7 = scalar_lea.sflag [#allocation3], %s904_s30 }
 0x37a   : > { %p1157_p2 = pnand %p1160_p4, %p1402_p8 }
 0x37c   : > { %1299 = dma.done.wait (!%p1157_p2), %s905_s7, 1024  }
 0x37d   : > { %1301 = vsyncadd (!%p1157_p2), %s905_s7, 4294966272  ;;  %s18_s20 = sadd.s32 1, %s1324_s20   ;;  %s1740_s15 = smov %s1308_s16 }
 0x37e   : > { %p15_p3 = scmp.ge.s32.totalorder %s18_s20, 4   ;;  %s1741_s16 = smov %s1312_s17 }
 0x37f   : > { %s1742_s17 = smov %s1408_s28  ;;  %s1743_s18 = smov %s1320_s19 }
 0x380   : > { %s1744_s19 = smov %s1746_s23  ;;  %17 = sbr.rel (!%p15_p3) target bundleno = 4 (0x4), region = 90 }
 0x387   :  { %934 = vsyncpa [#allocation3], 1 }
 0x388   :  { %936 = vsyncpa [#allocation3 + $0x1], 1 }

</bundles_post_ra>
